<compile_context>
chip_gen: v7x
topology: tpu7x:2x2x1
jax: 0.10.0
libtpu: 0.0.40
codegen_flags: <defaults>
</compile_context>

<pallas_src>
import functools

import jax
import jax.numpy as jnp
from jax import lax
from jax.experimental import pallas as pl
from jax.experimental.pallas import tpu as pltpu


def _label_smooth_kernel(x_ref, tgt_ref, loss_ref, *, smoothing, num_classes):
    """One row tile: per-row label-smoothed NLL, written as a (TM, 1) f32 block."""
    x = x_ref[...].astype(jnp.float32)                          # (TM, C)

    # Numerically stable log-softmax pieces (keepdims everywhere -> no relayouts).
    m = jnp.max(x, axis=-1, keepdims=True)                      # (TM, 1)
    shifted = x - m                                             # (TM, C)
    lse = jnp.log(jnp.sum(jnp.exp(shifted), axis=-1, keepdims=True))  # (TM, 1)

    # "Gather" the shifted logit at the target class via a lane-iota mask.
    col_ids = lax.broadcasted_iota(jnp.int32, x.shape, 1)       # (TM, C)
    tgt_mask = col_ids == tgt_ref[...]                          # (TM,1) bcast -> (TM,C)
    shifted_tgt = jnp.sum(jnp.where(tgt_mask, shifted, 0.0),
                          axis=-1, keepdims=True)               # (TM, 1)

    # Algebraic form of -(weight * log_prob).sum(-1) with
    #   weight_j = off for j != t, (1 - smoothing) at j == t:
    #   loss = -(off * sum_j logp_j + (1 - smoothing - off) * logp_t)
    # where sum_j logp_j = sum_j shifted_j - C * lse and logp_t = shifted_t - lse.
    # NOTE: num_classes == 1 deviates from PyTorch (which produces inf/nan weights).
    off_val = smoothing / (num_classes - 1.0) if num_classes > 1 else 0.0
    tgt_scale = 1.0 - smoothing - off_val
    logp_tgt = shifted_tgt - lse                                # (TM, 1)
    if off_val != 0.0:
        sum_logp = jnp.sum(shifted, axis=-1, keepdims=True) - num_classes * lse
        row_loss = -(off_val * sum_logp + tgt_scale * logp_tgt)
    else:
        row_loss = -(tgt_scale * logp_tgt)

    loss_ref[...] = row_loss                                    # (TM, 1)


def _choose_row_tile(n, c, block_bytes):
    """Largest row tile (multiple of 8) whose f32 logits block fits block_bytes."""
    rt = block_bytes // (4 * c)
    rt = max(8, min(2048, (rt // 8) * 8))
    n_up = ((n + 7) // 8) * 8          # never tile wider than the (padded) row count
    return max(8, min(rt, n_up))


def label_smooth_loss(logits, target, smoothing=0.0, row_tile=None,
                      block_bytes=4 * 1024 * 1024):
    """Pallas implementation of LabelSmoothLoss.forward(logits, target)."""
    n, c = logits.shape
    if row_tile is None:
        row_tile = _choose_row_tile(n, c, block_bytes)
    assert row_tile % 8 == 0

    num_tiles = pl.cdiv(n, row_tile)
    n_pad = num_tiles * row_tile
    if n_pad != n:
        # Zero-padded rows produce finite garbage losses; they are sliced off below.
        logits = jnp.pad(logits, ((0, n_pad - n), (0, 0)))
        target = jnp.pad(target, (0, n_pad - n))
    target_2d = target.astype(jnp.int32).reshape(n_pad, 1)

    kernel = functools.partial(
        _label_smooth_kernel, smoothing=float(smoothing), num_classes=c
    )

    per_row = pl.pallas_call(
        kernel,
        out_shape=jax.ShapeDtypeStruct((n_pad, 1), jnp.float32),
        grid_spec=pltpu.PrefetchScalarGridSpec(
            num_scalar_prefetch=0,
            grid=(num_tiles,),
            in_specs=[
                # TODO(synk): if profiling shows exposed DMA for very large C,
                # add pipeline_mode=pl.Buffered(3) on this logits spec.
                pl.BlockSpec((row_tile, c), lambda i: (i, 0)),
                pl.BlockSpec((row_tile, 1), lambda i: (i, 0)),
            ],
            out_specs=pl.BlockSpec((row_tile, 1), lambda i: (i, 0)),
        ),
        compiler_params=pltpu.CompilerParams(
            dimension_semantics=("parallel",),        # no cross-step state -> megacore OK
            vmem_limit_bytes=48 * 1024 * 1024,        # above 16/32 MiB defaults, < 64 MiB v7x
        ),
    )(logits, target_2d)

    # Tiny JAX epilogue: mean over the real rows (single tree reduce, good numerics).
    return jnp.sum(per_row[:n, 0]) / n


def _reference(logits, target, smoothing):
    # Plain-JAX reference mirroring the PyTorch module.
    logp = jax.nn.log_softmax(logits.astype(jnp.float32), axis=-1)
    c = logits.shape[-1]
    w = jnp.full(logits.shape, smoothing / (c - 1.0), jnp.float32)
    onehot = jax.nn.one_hot(target, c, dtype=jnp.float32)
    w = w * (1.0 - onehot) + onehot * (1.0 - smoothing)
    return (-w * logp).sum(axis=-1).mean()


if __name__ == "__main__":
    key = jax.random.PRNGKey(0)
    k1, k2, k3, k4 = jax.random.split(key, 4)

    # Main small test: 16 samples, 128 classes (lane-friendly).
    N, C = 16, 128
    smoothing = 0.1
    logits = jax.random.normal(k1, (N, C), dtype=jnp.float32)
    target = jax.random.randint(k2, (N,), 0, C, dtype=jnp.int32)

    loss = label_smooth_loss(logits, target, smoothing=smoothing)
    loss = jax.block_until_ready(loss)
    ref = _reference(logits, target, smoothing)
    assert jnp.allclose(loss, ref, atol=1e-5, rtol=1e-5), (loss, ref)

    # Second test: non-multiple-of-8 rows (padding path) and odd class count.
    N2, C2 = 20, 37
    smoothing2 = 0.25
    logits2 = jax.random.normal(k3, (N2, C2), dtype=jnp.float32)
    target2 = jax.random.randint(k4, (N2,), 0, C2, dtype=jnp.int32)

    loss2 = label_smooth_loss(logits2, target2, smoothing=smoothing2)
    loss2 = jax.block_until_ready(loss2)
    ref2 = _reference(logits2, target2, smoothing2)
    assert jnp.allclose(loss2, ref2, atol=1e-5, rtol=1e-5), (loss2, ref2)

    print("KERNEL_OK")
</pallas_src>

<mosaic_0001>
module attributes {stable_mosaic.version = 11 : i64} {
  func.func @_label_smooth_kernel(%arg0: i32, %arg1: memref<16x128xf32, #tpu.memory_space<vmem>>, %arg2: memref<16x1xi32, #tpu.memory_space<vmem>>, %arg3: memref<16x1xf32, #tpu.memory_space<vmem>>) attributes {dimension_semantics = [#tpu.dimension_semantics<parallel>], iteration_bounds = array<i64: 1>, scalar_prefetch = 0 : i64, scratch_operands = 0 : i64, tpu.core_type = #tpu.core_type<tc>, window_params = [{transform_indices = @transform_0, window_bounds = array<i64: 16, 128>}, {transform_indices = @transform_1, window_bounds = array<i64: 16, 1>}, {transform_indices = @transform_2, window_bounds = array<i64: 16, 1>}]} {
    %c0 = arith.constant 0 : index
    %c0_0 = arith.constant 0 : index
    %0 = vector.load %arg1[%c0, %c0_0] : memref<16x128xf32, #tpu.memory_space<vmem>>, vector<16x128xf32>
    %cst = arith.constant dense<0xFF800000> : vector<16xf32>
    %1 = vector.multi_reduction <maximumf>, %0, %cst [1] : vector<16x128xf32> to vector<16xf32>
    %2 = vector.shape_cast %1 : vector<16xf32> to vector<16x1xf32>
    %3 = vector.broadcast %2 : vector<16x1xf32> to vector<16x128xf32>
    %4 = arith.subf %0, %3 : vector<16x128xf32>
    %5 = math.exp %4 : vector<16x128xf32>
    %cst_1 = arith.constant dense<0.000000e+00> : vector<16xf32>
    %6 = vector.multi_reduction <add>, %5, %cst_1 [1] : vector<16x128xf32> to vector<16xf32>
    %7 = vector.shape_cast %6 : vector<16xf32> to vector<16x1xf32>
    %8 = math.log %7 : vector<16x1xf32>
    %9 = tpu.iota {dimensions = array<i32: 1>} : vector<16x128xi32>
    %c0_2 = arith.constant 0 : index
    %c0_3 = arith.constant 0 : index
    %10 = vector.load %arg2[%c0_2, %c0_3] : memref<16x1xi32, #tpu.memory_space<vmem>>, vector<16x1xi32>
    %11 = vector.broadcast %10 : vector<16x1xi32> to vector<16x128xi32>
    %12 = arith.cmpi eq, %9, %11 : vector<16x128xi32>
    %cst_4 = arith.constant 0.000000e+00 : f32
    %13 = vector.broadcast %cst_4 : f32 to vector<16x128xf32>
    %14 = arith.select %12, %4, %13 : vector<16x128xi1>, vector<16x128xf32>
    %cst_5 = arith.constant dense<0.000000e+00> : vector<16xf32>
    %15 = vector.multi_reduction <add>, %14, %cst_5 [1] : vector<16x128xf32> to vector<16xf32>
    %16 = vector.shape_cast %15 : vector<16xf32> to vector<16x1xf32>
    %17 = arith.subf %16, %8 : vector<16x1xf32>
    %cst_6 = arith.constant dense<0.000000e+00> : vector<16xf32>
    %18 = vector.multi_reduction <add>, %4, %cst_6 [1] : vector<16x128xf32> to vector<16xf32>
    %19 = vector.shape_cast %18 : vector<16xf32> to vector<16x1xf32>
    %cst_7 = arith.constant 1.280000e+02 : f32
    %20 = vector.broadcast %cst_7 : f32 to vector<16x1xf32>
    %21 = arith.mulf %20, %8 : vector<16x1xf32>
    %22 = arith.subf %19, %21 : vector<16x1xf32>
    %cst_8 = arith.constant 7.87401571E-4 : f32
    %23 = vector.broadcast %cst_8 : f32 to vector<16x1xf32>
    %24 = arith.mulf %23, %22 : vector<16x1xf32>
    %cst_9 = arith.constant 0.899212599 : f32
    %25 = vector.broadcast %cst_9 : f32 to vector<16x1xf32>
    %26 = arith.mulf %25, %17 : vector<16x1xf32>
    %27 = arith.addf %24, %26 : vector<16x1xf32>
    %cst_10 = arith.constant 0.000000e+00 : f32
    %28 = vector.broadcast %cst_10 : f32 to vector<16x1xf32>
    %29 = arith.subf %28, %27 : vector<16x1xf32>
    %c0_11 = arith.constant 0 : index
    %c0_12 = arith.constant 0 : index
    %30 = vector.load %arg3[%c0_11, %c0_12] : memref<16x1xf32, #tpu.memory_space<vmem>>, vector<16x1xf32>
    tpu.vector_store %arg3[%c0_11, %c0_12], %29 {strides = array<i32>} : memref<16x1xf32, #tpu.memory_space<vmem>>, vector<16x1xf32>,
    return
  }
  func.func @transform_0(%arg0: i32) -> (i32, i32) {
    %c0_i32 = arith.constant 0 : i32
    %c0_i32_0 = arith.constant 0 : i32
    return %arg0, %c0_i32 : i32, i32
  }
  func.func @transform_1(%arg0: i32) -> (i32, i32) {
    %c0_i32 = arith.constant 0 : i32
    %c0_i32_0 = arith.constant 0 : i32
    return %arg0, %c0_i32 : i32, i32
  }
  func.func @transform_2(%arg0: i32) -> (i32, i32) {
    %c0_i32 = arith.constant 0 : i32
    %c0_i32_0 = arith.constant 0 : i32
    return %arg0, %c0_i32 : i32, i32
  }
}

</mosaic_0001>

<bundles_post_ra>
// kernel: tpu_custom_call.1
= control target key start
LH: loop header
LB: loop body
LE: loop exit
PB: predicated region body
PF: predicated region fallthrough
CT: control target
= control target key end

     0   :  { %v85_v1 = vmov 0   ;;  %v31_v11 = vlaneseq  ;;  %vm67_vm2 = vcmask 7168   ;;  %s119_s0 = inlined_call_operand.vmem [shape: f32[16,128], index: 0, kind: input, shape index: {}]   ;;  %s120_s1 = inlined_call_operand.vmem [shape: s32[16,1], index: 1, kind: input, shape index: {}]   ;;  %s121_s2 = inlined_call_operand.vmem [shape: f32[16,1], index: 2, kind: output, shape index: {}]  }
   0x1   :  { %v11_v0 = vld [vmem:[%s119_s0] sm:$0xff]  ;;  %75 = vset.pattern.permute.xlu1 %v85_v1  ;;  %76 = vset.pattern.permute.xlu0 %v85_v1  ;;  %v12_v3 = vld [vmem:[%s119_s0 + $0x8] sm:$0xff] }
   0x2   :  { %v33_v2 = vld [vmem:[%s120_s1] sm:$0xff]  ;;  %13 = vmax.xlane.f32.xlu0 %v11_v0  ;;  %v34_v4 = vld [vmem:[%s120_s1 + $0x8] sm:$0xff]  ;;  %v32_v13 = vand.u32 127, %v31_v11 }
   0x3   :  { %36 = vperm.xlu1 %75, %v33_v2  }
   0x6   :  { %15 = vmax.xlane.f32.xlu0 %v12_v3 }
   0x7   :  { %39 = vperm.xlu1 %75, %v34_v4  }
  0x82   :  { %v37_v12 = vpop.permute.xlu1 %36 }
  0x83   :  { %vm41_vm0 = vcmp.eq.s32.totalorder %v32_v13, %v37_v12 }
  0x86   :  { %v40_v15 = vpop.permute.xlu1 %39 }
  0x87   :  { %vm42_vm1 = vcmp.eq.s32.totalorder %v32_v13, %v40_v15 }
  0x8f   :  { %v14_v5 = vpop.xlane.xlu0 %13 }
  0x90   :  { %v17_v6 = vsub.f32 %v11_v0, %v14_v5 }
  0x92   :  { %v19_v7 = vmul.f32 1.442695, %v17_v6  ;;  %v43_v17 = vsel %vm41_vm0, %v17_v6, 0.0 }
  0x93   :  { %v16_v8 = vpop.xlane.xlu0 %15 }
  0x94   :  { %77 = vpow2.f32 %v19_v7  ;;  %v18_v9 = vsub.f32 %v12_v3, %v16_v8 }
  0x96   :  { %v21_v10 = vmul.f32 1.442695, %v18_v9  ;;  %v44_v18 = vsel %vm42_vm1, %v18_v9, 0.0 }
  0x98   :  { %79 = vpow2.f32 %v21_v10 }
  0x9e   :  { %v78_v14 = vpop.eup %77 }
  0x9f   :  { %23 = vadd.xlane.f32.xlu0 %v78_v14 }
  0xa2   :  { %v80_v16 = vpop.eup %79 }
  0xa3   :  { %45 = vadd.xlane.f32.xlu0 %v43_v17  ;;  %25 = vadd.xlane.f32.xlu1 %v80_v16 }
  0xa7   :  { %47 = vadd.xlane.f32.xlu0 %v44_v18 }
  0xab   :  { %51 = vadd.xlane.f32.xlu0 %v17_v6 }
  0xaf   :  { %53 = vadd.xlane.f32.xlu0 %v18_v9 }
 0x12c   :  { %v24_v19 = vpop.xlane.xlu0 %23 }
 0x12d   :  { %81 = vlog2.f32 %v24_v19 }
 0x130   :  { %v26_v20 = vpop.xlane.xlu1 %25  ;;  %v46_v21 = vpop.xlane.xlu0 %45 }
 0x131   :  { %83 = vlog2.f32 %v26_v20 }
 0x134   :  { %v48_v22 = vpop.xlane.xlu0 %47 }
 0x137   :  { %v82_v23 = vpop.eup %81 }
 0x138   :  { %v28_v24 = vmul.f32 0.6931472, %v82_v23  ;;  %v52_v25 = vpop.xlane.xlu0 %51 }
 0x13a   :  { %v49_v26 = vsub.f32 %v46_v21, %v28_v24  ;;  %v55_v27 = vmul.f32 128.0, %v28_v24 }
 0x13b   :  { %v84_v28 = vpop.eup %83 }
 0x13c   :  { %v30_v29 = vmul.f32 0.6931472, %v84_v28  ;;  %v57_v30 = vsub.f32 %v52_v25, %v55_v27  ;;  %v61_v31 = vmul.f32 0.8992126, %v49_v26  ;;  %v54_v35 = vpop.xlane.xlu0 %53 }
 0x13e   :  { %v50_v32 = vsub.f32 %v48_v22, %v30_v29  ;;  %v59_v33 = vmul.f32 0.0007874016, %v57_v30  ;;  %v56_v34 = vmul.f32 128.0, %v30_v29 }
 0x140   :  { %v63_v36 = vadd.f32 %v61_v31, %v59_v33  ;;  %v58_v37 = vsub.f32 %v54_v35, %v56_v34  ;;  %v62_v38 = vmul.f32 0.8992126, %v50_v32 }
 0x142   :  { %v65_v39 = vsub.f32 0.0, %v63_v36  ;;  %v60_v40 = vmul.f32 0.0007874016, %v58_v37 }
 0x144   :  { %68 = vst.msk [vmem:[%s121_s2] sm:$0xff] %vm67_vm2, %v65_v39  ;;  %v64_v41 = vadd.f32 %v62_v38, %v60_v40 }
 0x146   :  { %v66_v42 = vsub.f32 0.0, %v64_v41 }
 0x148   :  { %69 = vst.msk [vmem:[%s121_s2 + $0x8] sm:$0xff] %vm67_vm2, %v66_v42 }

</bundles_post_ra>
